<compile_context>
chip_gen: v7x
topology: tpu7x:2x2x1
jax: 0.10.0
libtpu: 0.0.40
codegen_flags: <defaults>
</compile_context>

<pallas_src>
import functools

import jax
import jax.numpy as jnp
from jax.experimental import pallas as pl
from jax.experimental.pallas import tpu as pltpu

EPS = 1e-5
_LANE = 128
_VMEM_DATA_BUDGET = 16 << 20      # bytes of live double-buffered data blocks / step
_VMEM_LIMIT = 32 << 20            # explicit scoped-VMEM request


def _round_up(x, m):
    return ((x + m - 1) // m) * m


def _pick_hw_tile(C, HW):
    """Largest lane-aligned HW tile keeping ~4 live f32 blocks within budget."""
    max_tile = _VMEM_DATA_BUDGET // (4 * C * 4)
    max_tile = max(_LANE, (max_tile // _LANE) * _LANE)
    return min(max_tile, _round_up(HW, _LANE))


# ---------------------------------------------------------------------------
# Pass 1: per-(batch, channel) spatial mean / std of observed and referred.
# ---------------------------------------------------------------------------
def _stats_kernel(hw_true, obs_ref, ref_ref,
                  om_ref, os_ref, rm_ref, rs_ref,
                  o_sum, o_sq, r_sum, r_sq):
    t = pl.program_id(1)

    obs = obs_ref[...].astype(jnp.float32)                 # (C, hw_tile)
    ref = ref_ref[...].astype(jnp.float32)

    obs_s = jnp.sum(obs, axis=-1, keepdims=True)           # (C, 1)
    obs_q = jnp.sum(obs * obs, axis=-1, keepdims=True)
    ref_s = jnp.sum(ref, axis=-1, keepdims=True)
    ref_q = jnp.sum(ref * ref, axis=-1, keepdims=True)

    @pl.when(t == 0)
    def _():
        o_sum[...] = obs_s
        o_sq[...] = obs_q
        r_sum[...] = ref_s
        r_sq[...] = ref_q

    @pl.when(t > 0)
    def _():
        o_sum[...] += obs_s
        o_sq[...] += obs_q
        r_sum[...] += ref_s
        r_sq[...] += ref_q

    @pl.when(t == pl.num_programs(1) - 1)
    def _():
        n = jnp.float32(hw_true)
        denom = jnp.float32(max(hw_true - 1, 1))   # guard degenerate HW == 1
        om = o_sum[...] / n
        rm = r_sum[...] / n
        ov = (o_sq[...] - n * om * om) / denom     # unbiased (torch.var default)
        rv = (r_sq[...] - n * rm * rm) / denom
        om_ref[...] = om
        os_ref[...] = jnp.sqrt(ov + EPS)
        rm_ref[...] = rm
        rs_ref[...] = jnp.sqrt(rv + EPS)


# ---------------------------------------------------------------------------
# Pass 2: out = obs * scale + shift   (scale/shift per (batch, channel)).
# ---------------------------------------------------------------------------
def _apply_kernel(obs_ref, scale_ref, shift_ref, out_ref):
    x = obs_ref[...].astype(jnp.float32)                   # (C, hw_tile)
    out_ref[...] = (x * scale_ref[...] + shift_ref[...]).astype(out_ref.dtype)


def dac_forward(observed_feat, referred_feat, params):
    """observed_feat, referred_feat: (N, C, H, W) in NCHW, like PyTorch."""
    N, C, H, W = observed_feat.shape
    assert referred_feat.shape[:2] == (N, C)
    HW = H * W
    out_dtype = observed_feat.dtype

    hw_tile = _pick_hw_tile(C, HW)
    HW_pad = _round_up(HW, hw_tile)
    T = HW_pad // hw_tile
    pad = HW_pad - HW

    obs = observed_feat.reshape(N, C, HW)
    ref = referred_feat.reshape(N, C, HW)
    if pad:
        # Zero padding leaves sum / sum-of-squares untouched; denominators use
        # the true HW and padded output lanes are sliced off below.
        obs = jnp.pad(obs, ((0, 0), (0, 0), (0, pad)))
        ref = jnp.pad(ref, ((0, 0), (0, 0), (0, pad)))

    data_spec = pl.BlockSpec((pl.Squeezed(), C, hw_tile), lambda n, t: (n, 0, t))
    vec_spec = pl.BlockSpec((pl.Squeezed(), C, 1), lambda n, t: (n, 0, 0))
    stat_shape = jax.ShapeDtypeStruct((N, C, 1), jnp.float32)

    obs_m, obs_s, ref_m, ref_s = pl.pallas_call(
        functools.partial(_stats_kernel, HW),
        out_shape=(stat_shape,) * 4,
        grid_spec=pltpu.PrefetchScalarGridSpec(
            num_scalar_prefetch=0,
            grid=(N, T),
            in_specs=[data_spec, data_spec],
            out_specs=(vec_spec,) * 4,
            scratch_shapes=[pltpu.VMEM((C, 1), jnp.float32)] * 4,
        ),
        compiler_params=pltpu.CompilerParams(
            dimension_semantics=("parallel", "arbitrary"),
            vmem_limit_bytes=_VMEM_LIMIT,
        ),
    )(obs, ref)

    # Tiny bottleneck MLPs, batched over N as lane-dense XLA matmuls (hoisted
    # out of the kernel: a 1-column matvec would waste the MXU).
    def mlp(v, w1, w2):                       # v: (N, C)
        h = jnp.maximum(v @ w1.T, 0.0)        # (N, C//16)
        return h @ w2.T                       # (N, C)

    rm_t = mlp(ref_m[..., 0], params["w1_mean"], params["w2_mean"])[..., None]
    rs_t = mlp(ref_s[..., 0], params["w1_std"], params["w2_std"])[..., None]

    # Fold normalize + affine into one per-channel scale/shift (tiny (N,C,1) ops).
    scale = rs_t / obs_s                      # (N, C, 1)
    shift = rm_t - obs_m * scale

    out = pl.pallas_call(
        _apply_kernel,
        out_shape=jax.ShapeDtypeStruct((N, C, HW_pad), out_dtype),
        grid_spec=pltpu.PrefetchScalarGridSpec(
            num_scalar_prefetch=0,
            grid=(N, T),
            in_specs=[data_spec, vec_spec, vec_spec],
            out_specs=data_spec,
        ),
        compiler_params=pltpu.CompilerParams(
            dimension_semantics=("parallel", "parallel"),
            vmem_limit_bytes=_VMEM_LIMIT,
        ),
    )(obs, scale, shift)

    return out[:, :, :HW].reshape(N, C, H, W)


def dac_reference(observed_feat, referred_feat, params):
    """Pure-JAX reference mirroring the PyTorch forward."""
    N, C, H, W = observed_feat.shape

    def mean_std(x):
        xf = x.reshape(N, C, -1).astype(jnp.float32)
        m = xf.mean(axis=-1)
        v = xf.var(axis=-1, ddof=1)
        return m, jnp.sqrt(v + EPS)

    om, os_ = mean_std(observed_feat)
    rm, rs = mean_std(referred_feat)

    def mlp(v, w1, w2):  # v: (N, C)
        h = jnp.maximum(v @ w1.T, 0.0)
        return h @ w2.T

    rm_t = mlp(rm, params["w1_mean"], params["w2_mean"])
    rs_t = mlp(rs, params["w1_std"], params["w2_std"])

    normalized = (observed_feat - om[:, :, None, None]) / os_[:, :, None, None]
    return normalized * rs_t[:, :, None, None] + rm_t[:, :, None, None]


def init_params(key, n_channels):
    cmid = n_channels // 16
    k1, k2, k3, k4 = jax.random.split(key, 4)
    # Conv2d(C, C//16, 1, bias=False).weight -> (C//16, C); Conv2d(C//16, C, 1) -> (C, C//16)
    return {
        "w1_mean": 0.1 * jax.random.normal(k1, (cmid, n_channels), jnp.float32),
        "w2_mean": 0.1 * jax.random.normal(k2, (n_channels, cmid), jnp.float32),
        "w1_std": 0.1 * jax.random.normal(k3, (cmid, n_channels), jnp.float32),
        "w2_std": 0.1 * jax.random.normal(k4, (n_channels, cmid), jnp.float32),
    }


if __name__ == "__main__":
    key = jax.random.PRNGKey(0)
    k_obs, k_ref, k_w = jax.random.split(key, 3)

    N, C, H, W = 2, 32, 16, 16   # C must be >= 16 for the C//16 bottleneck
    observed = jax.random.normal(k_obs, (N, C, H, W), jnp.float32)
    referred = 1.5 * jax.random.normal(k_ref, (N, C, H, W), jnp.float32) + 0.3

    params = init_params(k_w, C)

    out = dac_forward(observed, referred, params)
    out = jax.block_until_ready(out)

    ref_out = dac_reference(observed, referred, params)
    assert out.shape == (N, C, H, W)
    assert jnp.allclose(out, ref_out, atol=5e-4, rtol=5e-4), "mismatch vs reference"

    print("KERNEL_OK")
</pallas_src>

<mosaic_0001>
module attributes {stable_mosaic.version = 11 : i64} {
  func.func @_stats_kernel(%arg0: i32, %arg1: i32, %arg2: memref<1x32x256xf32, #tpu.memory_space<vmem>>, %arg3: memref<1x32x256xf32, #tpu.memory_space<vmem>>, %arg4: memref<1x32x1xf32, #tpu.memory_space<vmem>>, %arg5: memref<1x32x1xf32, #tpu.memory_space<vmem>>, %arg6: memref<1x32x1xf32, #tpu.memory_space<vmem>>, %arg7: memref<1x32x1xf32, #tpu.memory_space<vmem>>, %arg8: memref<32x1xf32, #tpu.memory_space<vmem>>, %arg9: memref<32x1xf32, #tpu.memory_space<vmem>>, %arg10: memref<32x1xf32, #tpu.memory_space<vmem>>, %arg11: memref<32x1xf32, #tpu.memory_space<vmem>>) attributes {dimension_semantics = [#tpu.dimension_semantics<parallel>, #tpu.dimension_semantics<arbitrary>], iteration_bounds = array<i64: 2, 1>, scalar_prefetch = 0 : i64, scratch_operands = 4 : i64, tpu.core_type = #tpu.core_type<tc>, window_params = [{transform_indices = @transform_0, window_bounds = array<i64: 1, 32, 256>}, {transform_indices = @transform_1, window_bounds = array<i64: 1, 32, 256>}, {transform_indices = @transform_2, window_bounds = array<i64: 1, 32, 1>}, {transform_indices = @transform_3, window_bounds = array<i64: 1, 32, 1>}, {transform_indices = @transform_4, window_bounds = array<i64: 1, 32, 1>}, {transform_indices = @transform_5, window_bounds = array<i64: 1, 32, 1>}]} {
    %c0 = arith.constant 0 : index
    %c0_0 = arith.constant 0 : index
    %c0_1 = arith.constant 0 : index
    %0 = vector.load %arg2[%c0, %c0_0, %c0_1] : memref<1x32x256xf32, #tpu.memory_space<vmem>>, vector<1x32x256xf32>
    %1 = vector.shape_cast %0 : vector<1x32x256xf32> to vector<32x256xf32>
    %c0_2 = arith.constant 0 : index
    %c0_3 = arith.constant 0 : index
    %c0_4 = arith.constant 0 : index
    %2 = vector.load %arg3[%c0_2, %c0_3, %c0_4] : memref<1x32x256xf32, #tpu.memory_space<vmem>>, vector<1x32x256xf32>
    %3 = vector.shape_cast %2 : vector<1x32x256xf32> to vector<32x256xf32>
    %cst = arith.constant dense<0.000000e+00> : vector<32xf32>
    %4 = vector.multi_reduction <add>, %1, %cst [1] : vector<32x256xf32> to vector<32xf32>
    %5 = vector.shape_cast %4 : vector<32xf32> to vector<32x1xf32>
    %6 = arith.mulf %1, %1 : vector<32x256xf32>
    %cst_5 = arith.constant dense<0.000000e+00> : vector<32xf32>
    %7 = vector.multi_reduction <add>, %6, %cst_5 [1] : vector<32x256xf32> to vector<32xf32>
    %8 = vector.shape_cast %7 : vector<32xf32> to vector<32x1xf32>
    %cst_6 = arith.constant dense<0.000000e+00> : vector<32xf32>
    %9 = vector.multi_reduction <add>, %3, %cst_6 [1] : vector<32x256xf32> to vector<32xf32>
    %10 = vector.shape_cast %9 : vector<32xf32> to vector<32x1xf32>
    %11 = arith.mulf %3, %3 : vector<32x256xf32>
    %cst_7 = arith.constant dense<0.000000e+00> : vector<32xf32>
    %12 = vector.multi_reduction <add>, %11, %cst_7 [1] : vector<32x256xf32> to vector<32xf32>
    %13 = vector.shape_cast %12 : vector<32xf32> to vector<32x1xf32>
    %c0_i32 = arith.constant 0 : i32
    %14 = arith.cmpi eq, %arg1, %c0_i32 : i32
    %15 = arith.extui %14 : i1 to i32
    %c0_i32_8 = arith.constant 0 : i32
    %16 = arith.cmpi ne, %15, %c0_i32_8 : i32
    scf.if %16 {
      %c0_13 = arith.constant 0 : index
      %c0_14 = arith.constant 0 : index
      %23 = vector.load %arg8[%c0_13, %c0_14] : memref<32x1xf32, #tpu.memory_space<vmem>>, vector<32x1xf32>
      tpu.vector_store %arg8[%c0_13, %c0_14], %5 {strides = array<i32>} : memref<32x1xf32, #tpu.memory_space<vmem>>, vector<32x1xf32>,
      %c0_15 = arith.constant 0 : index
      %c0_16 = arith.constant 0 : index
      %24 = vector.load %arg9[%c0_15, %c0_16] : memref<32x1xf32, #tpu.memory_space<vmem>>, vector<32x1xf32>
      tpu.vector_store %arg9[%c0_15, %c0_16], %8 {strides = array<i32>} : memref<32x1xf32, #tpu.memory_space<vmem>>, vector<32x1xf32>,
      %c0_17 = arith.constant 0 : index
      %c0_18 = arith.constant 0 : index
      %25 = vector.load %arg10[%c0_17, %c0_18] : memref<32x1xf32, #tpu.memory_space<vmem>>, vector<32x1xf32>
      tpu.vector_store %arg10[%c0_17, %c0_18], %10 {strides = array<i32>} : memref<32x1xf32, #tpu.memory_space<vmem>>, vector<32x1xf32>,
      %c0_19 = arith.constant 0 : index
      %c0_20 = arith.constant 0 : index
      %26 = vector.load %arg11[%c0_19, %c0_20] : memref<32x1xf32, #tpu.memory_space<vmem>>, vector<32x1xf32>
      tpu.vector_store %arg11[%c0_19, %c0_20], %13 {strides = array<i32>} : memref<32x1xf32, #tpu.memory_space<vmem>>, vector<32x1xf32>,
    } else {
    }
    %c0_i32_9 = arith.constant 0 : i32
    %17 = arith.cmpi sgt, %arg1, %c0_i32_9 : i32
    %18 = arith.extui %17 : i1 to i32
    %c0_i32_10 = arith.constant 0 : i32
    %19 = arith.cmpi ne, %18, %c0_i32_10 : i32
    scf.if %19 {
      %c0_13 = arith.constant 0 : index
      %c0_14 = arith.constant 0 : index
      %23 = vector.load %arg8[%c0_13, %c0_14] : memref<32x1xf32, #tpu.memory_space<vmem>>, vector<32x1xf32>
      %24 = arith.addf %23, %5 : vector<32x1xf32>
      %c0_15 = arith.constant 0 : index
      %c0_16 = arith.constant 0 : index
      %25 = vector.load %arg8[%c0_15, %c0_16] : memref<32x1xf32, #tpu.memory_space<vmem>>, vector<32x1xf32>
      tpu.vector_store %arg8[%c0_15, %c0_16], %24 {strides = array<i32>} : memref<32x1xf32, #tpu.memory_space<vmem>>, vector<32x1xf32>,
      %c0_17 = arith.constant 0 : index
      %c0_18 = arith.constant 0 : index
      %26 = vector.load %arg9[%c0_17, %c0_18] : memref<32x1xf32, #tpu.memory_space<vmem>>, vector<32x1xf32>
      %27 = arith.addf %26, %8 : vector<32x1xf32>
      %c0_19 = arith.constant 0 : index
      %c0_20 = arith.constant 0 : index
      %28 = vector.load %arg9[%c0_19, %c0_20] : memref<32x1xf32, #tpu.memory_space<vmem>>, vector<32x1xf32>
      tpu.vector_store %arg9[%c0_19, %c0_20], %27 {strides = array<i32>} : memref<32x1xf32, #tpu.memory_space<vmem>>, vector<32x1xf32>,
      %c0_21 = arith.constant 0 : index
      %c0_22 = arith.constant 0 : index
      %29 = vector.load %arg10[%c0_21, %c0_22] : memref<32x1xf32, #tpu.memory_space<vmem>>, vector<32x1xf32>
      %30 = arith.addf %29, %10 : vector<32x1xf32>
      %c0_23 = arith.constant 0 : index
      %c0_24 = arith.constant 0 : index
      %31 = vector.load %arg10[%c0_23, %c0_24] : memref<32x1xf32, #tpu.memory_space<vmem>>, vector<32x1xf32>
      tpu.vector_store %arg10[%c0_23, %c0_24], %30 {strides = array<i32>} : memref<32x1xf32, #tpu.memory_space<vmem>>, vector<32x1xf32>,
      %c0_25 = arith.constant 0 : index
      %c0_26 = arith.constant 0 : index
      %32 = vector.load %arg11[%c0_25, %c0_26] : memref<32x1xf32, #tpu.memory_space<vmem>>, vector<32x1xf32>
      %33 = arith.addf %32, %13 : vector<32x1xf32>
      %c0_27 = arith.constant 0 : index
      %c0_28 = arith.constant 0 : index
      %34 = vector.load %arg11[%c0_27, %c0_28] : memref<32x1xf32, #tpu.memory_space<vmem>>, vector<32x1xf32>
      tpu.vector_store %arg11[%c0_27, %c0_28], %33 {strides = array<i32>} : memref<32x1xf32, #tpu.memory_space<vmem>>, vector<32x1xf32>,
    } else {
    }
    %c0_i32_11 = arith.constant 0 : i32
    %20 = arith.cmpi eq, %arg1, %c0_i32_11 : i32
    %21 = arith.extui %20 : i1 to i32
    %c0_i32_12 = arith.constant 0 : i32
    %22 = arith.cmpi ne, %21, %c0_i32_12 : i32
    scf.if %22 {
      %c0_13 = arith.constant 0 : index
      %c0_14 = arith.constant 0 : index
      %23 = vector.load %arg8[%c0_13, %c0_14] : memref<32x1xf32, #tpu.memory_space<vmem>>, vector<32x1xf32>
      %cst_15 = arith.constant 2.560000e+02 : f32
      %24 = vector.broadcast %cst_15 : f32 to vector<32x1xf32>
      %25 = arith.divf %23, %24 : vector<32x1xf32>
      %c0_16 = arith.constant 0 : index
      %c0_17 = arith.constant 0 : index
      %26 = vector.load %arg10[%c0_16, %c0_17] : memref<32x1xf32, #tpu.memory_space<vmem>>, vector<32x1xf32>
      %cst_18 = arith.constant 2.560000e+02 : f32
      %27 = vector.broadcast %cst_18 : f32 to vector<32x1xf32>
      %28 = arith.divf %26, %27 : vector<32x1xf32>
      %c0_19 = arith.constant 0 : index
      %c0_20 = arith.constant 0 : index
      %29 = vector.load %arg9[%c0_19, %c0_20] : memref<32x1xf32, #tpu.memory_space<vmem>>, vector<32x1xf32>
      %cst_21 = arith.constant 2.560000e+02 : f32
      %30 = vector.broadcast %cst_21 : f32 to vector<32x1xf32>
      %31 = arith.mulf %30, %25 : vector<32x1xf32>
      %32 = arith.mulf %31, %25 : vector<32x1xf32>
      %33 = arith.subf %29, %32 : vector<32x1xf32>
      %cst_22 = arith.constant 2.550000e+02 : f32
      %34 = vector.broadcast %cst_22 : f32 to vector<32x1xf32>
      %35 = arith.divf %33, %34 : vector<32x1xf32>
      %c0_23 = arith.constant 0 : index
      %c0_24 = arith.constant 0 : index
      %36 = vector.load %arg11[%c0_23, %c0_24] : memref<32x1xf32, #tpu.memory_space<vmem>>, vector<32x1xf32>
      %cst_25 = arith.constant 2.560000e+02 : f32
      %37 = vector.broadcast %cst_25 : f32 to vector<32x1xf32>
      %38 = arith.mulf %37, %28 : vector<32x1xf32>
      %39 = arith.mulf %38, %28 : vector<32x1xf32>
      %40 = arith.subf %36, %39 : vector<32x1xf32>
      %cst_26 = arith.constant 2.550000e+02 : f32
      %41 = vector.broadcast %cst_26 : f32 to vector<32x1xf32>
      %42 = arith.divf %40, %41 : vector<32x1xf32>
      %c0_27 = arith.constant 0 : index
      %c0_28 = arith.constant 0 : index
      %c0_29 = arith.constant 0 : index
      %43 = vector.load %arg4[%c0_27, %c0_28, %c0_29] : memref<1x32x1xf32, #tpu.memory_space<vmem>>, vector<1x32x1xf32>
      %44 = vector.shape_cast %43 : vector<1x32x1xf32> to vector<32x1xf32>
      %45 = vector.shape_cast %25 : vector<32x1xf32> to vector<1x32x1xf32>
      tpu.vector_store %arg4[%c0_27, %c0_28, %c0_29], %45 {strides = array<i32>} : memref<1x32x1xf32, #tpu.memory_space<vmem>>, vector<1x32x1xf32>,
      %cst_30 = arith.constant 9.99999974E-6 : f32
      %46 = vector.broadcast %cst_30 : f32 to vector<32x1xf32>
      %47 = arith.addf %35, %46 : vector<32x1xf32>
      %48 = math.sqrt %47 : vector<32x1xf32>
      %c0_31 = arith.constant 0 : index
      %c0_32 = arith.constant 0 : index
      %c0_33 = arith.constant 0 : index
      %49 = vector.load %arg5[%c0_31, %c0_32, %c0_33] : memref<1x32x1xf32, #tpu.memory_space<vmem>>, vector<1x32x1xf32>
      %50 = vector.shape_cast %49 : vector<1x32x1xf32> to vector<32x1xf32>
      %51 = vector.shape_cast %48 : vector<32x1xf32> to vector<1x32x1xf32>
      tpu.vector_store %arg5[%c0_31, %c0_32, %c0_33], %51 {strides = array<i32>} : memref<1x32x1xf32, #tpu.memory_space<vmem>>, vector<1x32x1xf32>,
      %c0_34 = arith.constant 0 : index
      %c0_35 = arith.constant 0 : index
      %c0_36 = arith.constant 0 : index
      %52 = vector.load %arg6[%c0_34, %c0_35, %c0_36] : memref<1x32x1xf32, #tpu.memory_space<vmem>>, vector<1x32x1xf32>
      %53 = vector.shape_cast %52 : vector<1x32x1xf32> to vector<32x1xf32>
      %54 = vector.shape_cast %28 : vector<32x1xf32> to vector<1x32x1xf32>
      tpu.vector_store %arg6[%c0_34, %c0_35, %c0_36], %54 {strides = array<i32>} : memref<1x32x1xf32, #tpu.memory_space<vmem>>, vector<1x32x1xf32>,
      %cst_37 = arith.constant 9.99999974E-6 : f32
      %55 = vector.broadcast %cst_37 : f32 to vector<32x1xf32>
      %56 = arith.addf %42, %55 : vector<32x1xf32>
      %57 = math.sqrt %56 : vector<32x1xf32>
      %c0_38 = arith.constant 0 : index
      %c0_39 = arith.constant 0 : index
      %c0_40 = arith.constant 0 : index
      %58 = vector.load %arg7[%c0_38, %c0_39, %c0_40] : memref<1x32x1xf32, #tpu.memory_space<vmem>>, vector<1x32x1xf32>
      %59 = vector.shape_cast %58 : vector<1x32x1xf32> to vector<32x1xf32>
      %60 = vector.shape_cast %57 : vector<32x1xf32> to vector<1x32x1xf32>
      tpu.vector_store %arg7[%c0_38, %c0_39, %c0_40], %60 {strides = array<i32>} : memref<1x32x1xf32, #tpu.memory_space<vmem>>, vector<1x32x1xf32>,
    } else {
    }
    return
  }
  func.func @transform_0(%arg0: i32, %arg1: i32) -> (i32, i32, i32) {
    %c0_i32 = arith.constant 0 : i32
    %c0_i32_0 = arith.constant 0 : i32
    return %arg0, %c0_i32, %arg1 : i32, i32, i32
  }
  func.func @transform_1(%arg0: i32, %arg1: i32) -> (i32, i32, i32) {
    %c0_i32 = arith.constant 0 : i32
    %c0_i32_0 = arith.constant 0 : i32
    return %arg0, %c0_i32, %arg1 : i32, i32, i32
  }
  func.func @transform_2(%arg0: i32, %arg1: i32) -> (i32, i32, i32) {
    %c0_i32 = arith.constant 0 : i32
    %c0_i32_0 = arith.constant 0 : i32
    %c0_i32_1 = arith.constant 0 : i32
    return %arg0, %c0_i32, %c0_i32_0 : i32, i32, i32
  }
  func.func @transform_3(%arg0: i32, %arg1: i32) -> (i32, i32, i32) {
    %c0_i32 = arith.constant 0 : i32
    %c0_i32_0 = arith.constant 0 : i32
    %c0_i32_1 = arith.constant 0 : i32
    return %arg0, %c0_i32, %c0_i32_0 : i32, i32, i32
  }
  func.func @transform_4(%arg0: i32, %arg1: i32) -> (i32, i32, i32) {
    %c0_i32 = arith.constant 0 : i32
    %c0_i32_0 = arith.constant 0 : i32
    %c0_i32_1 = arith.constant 0 : i32
    return %arg0, %c0_i32, %c0_i32_0 : i32, i32, i32
  }
  func.func @transform_5(%arg0: i32, %arg1: i32) -> (i32, i32, i32) {
    %c0_i32 = arith.constant 0 : i32
    %c0_i32_0 = arith.constant 0 : i32
    %c0_i32_1 = arith.constant 0 : i32
    return %arg0, %c0_i32, %c0_i32_0 : i32, i32, i32
  }
}

</mosaic_0001>

<bundles_post_ra>
// kernel: tpu_custom_call.1
= control target key start
LH: loop header
LB: loop body
LE: loop exit
PB: predicated region body
PF: predicated region fallthrough
CT: control target
= control target key end

     0   :  { %11 = vsyncpa [#allocation7], 0  ;;  %s1337_s0 = inlined_call_operand.hbm [shape: f32[2,32,256], index: 0, kind: input, shape index: {}]   ;;  %s1338_s1 = inlined_call_operand.hbm [shape: f32[2,32,256], index: 1, kind: input, shape index: {}]   ;;  %s1339_s2 = inlined_call_operand.vmem [shape: f32[2,32,1], index: 2, kind: output, shape index: {0}]   ;;  %s1340_s3 = inlined_call_operand.vmem [shape: f32[2,32,1], index: 3, kind: output, shape index: {1}]   ;;  %s1341_s4 = inlined_call_operand.vmem [shape: f32[2,32,1], index: 4, kind: output, shape index: {2}]   ;;  %s1342_s5 = inlined_call_operand.vmem [shape: f32[2,32,1], index: 5, kind: output, shape index: {3}]  }
   0x1   :  { %13 = vsyncpa [#allocation7 + $0x1], 0 }
   0x2   :  { %14 = vsyncpa [#allocation9], 0 }
   0x3   :  { %16 = vsyncpa [#allocation9 + $0x1], 0  ;;  %s1100_s18 = smov 0   ;;  %s1102_s19 = smov 0  }
   0x4   :  { %s1104_s20 = smov 0   ;;  %s1106_s21 = smov 0  }
   0x5   :  { %s1108_s22 = smov 0   ;;  %s1110_s23 = smov 0  }
   0x6 LB: > { %s843_s24 = sadd.s32 4294967295, %s1064_s23   ;;  %s34_s25 = sadd.s32 1, %s1060_s22  ;;  %s1064_s23 = sphi %s1110_s23, %s22_s23   ;;  %s1060_s22 = sphi %s1108_s22, %s1353_s22   ;;  %s1056_s21 = sphi %s1106_s21, %s1352_s21   ;;  %s1052_s20 = sphi %s1104_s20, %s1351_s20   ;;  %s1048_s19 = sphi %s1102_s19, %s1350_s19   ;;  %s1044_s18 = sphi %s1100_s18, %s1349_s18  }
   0x7   : > { %p36_p0 = scmp.ge.s32.totalorder %s34_s25, 2  ;;  %s43_s26 = sadd.s32 1, %s1052_s20 }
   0x8   : > { %p50_p1 = scmp.ne.s32.totalorder %s1052_s20, %s1048_s19  ;;  %p51_p2 = scmp.eq.s32.totalorder %s1064_s23, 0 }
   0x9   : > { %s1355_s25 = smov (%p36_p0, %s34_s25), 0  ;;  %p56_p4 = scmp.ne.s32.totalorder %s1048_s19, %s1044_s18 }
   0xa   : > { %p1136_p3 = por %p51_p2, %p50_p1  ;;  %s38_s28 = ssub.s32 %s1060_s22, %s1355_s25 }
   0xb   : > { %p57_p5 = scmp.eq.s32.totalorder %s843_s24, 0  ;;  %p41_p6 = scmp.eq.s32.totalorder %s38_s28, 0 }
   0xc   : > { %p883_p8 = scmp.lt.s32.totalorder %s1064_s23, 2  ;;  %s1152_s6 = sand.u32 1, %s1052_s20  }
   0xd   : > { %p1143_p7 = por %p57_p5, %p56_p4  ;;  %s866_s7 = sshll.u32 %s1060_s22, 10 }
   0xe   : > { %s1149_s30 = scalar_select %p41_p6, %s1052_s20, %s43_s26  }
   0xf   : > { %s1345_s29 = scalar_select %p1143_p7, 1, 0 }
  0x10   : > { %s847_s8 = sshll.u32 %s1152_s6, 6  ;;  %s1161_s11 = scalar_lea.hbm %s1337_s0, %s866_s7 }
  0x11   : > { %s216_s12 = scalar_lea.vmem [#allocation6], %s847_s8  ;;  %p1167_p9 = pnand %p883_p8, %p1136_p3 }
  0x12   : > { %s225_s13 = sshll.u32 %s216_s12, 4  ;;  %s213_s15 = scalar_lea.sflag [#allocation7], %s1152_s6  ;;  %s1171_s13 = int_to_ptr.vmem [resolvable:$true] %s225_s13 }
  0x13   : > { %s950_s16 = scalar_lea.hbm %s1161_s11, 1024  ;;  %p952_p11 = pneg %p1167_p9 }
  0x14   : > { %p951_p10 = scmp.ne.s32.totalorder %s1161_s11, %s950_s16  ;;  %s955_s24 = scalar_lea.hbm %s1337_s0, 2048 }
  0x15   : > { %p956_p0 = scmp.lt.u32.totalorder %s1161_s11, %s1337_s0  ;;  %p957_p1 = scmp.lt.u32.totalorder %s955_s24, %s950_s16 }
  0x16   : > { %p953_p12 = pnand %p952_p11, %p951_p10  ;;  %p959_p3 = scmp.lt.u32.totalorder %s950_s16, %s1161_s11 }
  0x17   : > { %p958_p2 = por %p957_p1, %p956_p0 }
  0x18   : > { %p954_p13 = pneg %p953_p12 }
  0x19   : > { %p960_p4 = por %p959_p3, %p958_p2 }
  0x1b   : > { %p961_p5 = pnand %p960_p4, %p954_p13 }
  0x1d   : > { %964 = shalt.err (!%p961_p5)
}
  0x1e   : > { %s965_s28 = scalar_lea.vmem %s1171_s13, 1024  ;;  %s1066_s9 = smov [#allocation6]  }
  0x1f   : > { %p966_p6 = scmp.ne.s32.totalorder %s1171_s13, %s965_s28  ;;  %s970_s10 = sshll.u32 %s1066_s9, 4  ;;  %s971_s10 = int_to_ptr.vmem [resolvable:$false] %s970_s10 }
  0x20   : > { %s972_s12 = scalar_lea.vmem %s971_s10, 2048  ;;  %p973_p12 = scmp.lt.s32.totalorder %s1171_s13, %s971_s10 }
  0x21   : > { %p968_p8 = pnand %p966_p6, %p952_p11  ;;  %p974_p0 = scmp.lt.s32.totalorder %s972_s12, %s965_s28 }
  0x23   : > { %p969_p10 = pneg %p968_p8  ;;  %p975_p1 = por %p974_p0, %p973_p12 }
  0x25   : > { %p976_p2 = pnand %p975_p1, %p969_p10 }
  0x27   : > { %979 = shalt.err (!%p976_p2)
}
  0x28   : > { %s1067_s16 = smov 256   ;;  %s1068_s17 = smov 16  }
  0x29   : > { %879 = dma.hbm_to_vmem [thread:$0]  (!%p1167_p9), %s1161_s11, 1024, %s1171_s13, %s213_s15, %s1067_s16, %s1067_s16, %s1068_s17  }
  0x2a   : > { %p853_p13 = scmp.ge.s32.totalorder %s1064_s23, 1  ;;  %p256_p3 = scmp.lt.s32.totalorder %s1064_s23, 3 }
  0x2b   : > { %s1215_s27 = scalar_lea.hbm %s1338_s1, %s866_s7  ;;  %s239_s28 = scalar_lea.vmem [#allocation8], %s847_s8 }
  0x2c   : > { %p1206_p4 = pnand %p853_p13, %p256_p3  ;;  %s248_s9 = sshll.u32 %s239_s28, 4  ;;  %s1219_s9 = int_to_ptr.vmem [resolvable:$true] %s248_s9 }
  0x2d   : > { %s236_s11 = scalar_lea.sflag [#allocation9], %s1152_s6  ;;  %s980_s13 = scalar_lea.hbm %s1215_s27, 1024 }
  0x2e   : > { %p981_p5 = scmp.ne.s32.totalorder %s1215_s27, %s980_s13  ;;  %s985_s7 = scalar_lea.hbm %s1338_s1, 2048 }
  0x2f   : > { %p986_p10 = scmp.lt.u32.totalorder %s1215_s27, %s1338_s1  ;;  %p987_p12 = scmp.lt.u32.totalorder %s985_s7, %s980_s13 }
  0x30   : > { %p983_p6 = pnand %p981_p5, %p952_p11  ;;  %p989_p1 = scmp.lt.u32.totalorder %s980_s13, %s1215_s27 }
  0x31   : > { %p988_p0 = por %p987_p12, %p986_p10 }
  0x32   : > { %p984_p8 = pneg %p983_p6 }
  0x33   : > { %p990_p2 = por %p989_p1, %p988_p0 }
  0x35   : > { %p991_p13 = pnand %p990_p2, %p984_p8 }
  0x37   : > { %994 = shalt.err (!%p991_p13)
}
  0x38   : > { %s995_s8 = scalar_lea.vmem %s1219_s9, 1024  ;;  %s1069_s26 = smov [#allocation8]  }
  0x39   : > { %p996_p3 = scmp.ne.s32.totalorder %s1219_s9, %s995_s8  ;;  %s1000_s28 = sshll.u32 %s1069_s26, 4  ;;  %s1001_s28 = int_to_ptr.vmem [resolvable:$false] %s1000_s28 }
  0x3a   : > { %s1002_s15 = scalar_lea.vmem %s1001_s28, 2048  ;;  %p1003_p7 = scmp.lt.s32.totalorder %s1219_s9, %s1001_s28 }
  0x3b   : > { %p998_p5 = pnand %p996_p3, %p952_p11  ;;  %p1004_p10 = scmp.lt.s32.totalorder %s1002_s15, %s995_s8 }
  0x3d   : > { %p999_p6 = pneg %p998_p5  ;;  %p1005_p12 = por %p1004_p10, %p1003_p7 }
  0x3f   : > { %p1006_p0 = pnand %p1005_p12, %p999_p6 }
  0x41   : > { %1009 = shalt.err (!%p1006_p0)
}
  0x42   : > { %882 = dma.hbm_to_vmem [thread:$0]  (!%p1167_p9), %s1215_s27, 1024, %s1219_s9, %s236_s11, %s1067_s16, %s1067_s16, %s1068_s17  }
  0x43   : > { %260 = sbr.rel (%p1206_p4) target bundleno = 281 (0x119), region = 28  ;;  %s262_s13 = sand.u32 (!%p1206_p4), 1, %s1048_s19  }
  0x44   : > { %s854_s10 = sshll.u32 (!%p1206_p4), %s262_s13, 6  ;;  %s263_s7 = scalar_lea.sflag (!%p1206_p4), [#allocation7], %s262_s13 }
  0x45   : > { %s266_s12 = scalar_lea.vmem (!%p1206_p4), [#allocation6], %s854_s10  ;;  %p1348_p7 = scmp.ne.s32.totalorder (!%p1206_p4), %s1345_s29, 0 }
  0x4a   : > { %1035 = dma.done.wait (%p1348_p7), %s263_s7, 1024  }
  0x4b   : > { %1037 = vsyncadd (%p1348_p7), %s263_s7, 4294966272  ;;  %s272_s14 = scalar_lea.sflag [#allocation9], %s262_s13  ;;  %s275_s6 = scalar_lea.vmem [#allocation8], %s854_s10 }
  0x4c   : > { %1039 = dma.done.wait (%p1348_p7), %s272_s14, 1024  }
  0x4d   : > { %1041 = vsyncadd (%p1348_p7), %s272_s14, 4294966272  ;;  %v348_v0 = vld [vmem:[%s266_s12 + $0x20] sm:$0xff]  ;;  %v349_v1 = vld [vmem:[%s266_s12 + $0x28] sm:$0xff]  ;;  %p324_p9 = scmp.lt.s32.totalorder %s1056_s21, 1  ;;  %vm428_vm0 = vcmask 7168  }
  0x4e   : > { %v344_v2 = vld [vmem:[%s266_s12] sm:$0xff]  ;;  %v366_v3 = vadd.f32 %v349_v1, %v348_v0  ;;  %v345_v4 = vld [vmem:[%s266_s12 + $0x8] sm:$0xff]  ;;  %v350_v5 = vld [vmem:[%s266_s12 + $0x30] sm:$0xff]  ;;  %v376_v31 = vmul.f32 %v348_v0, %v348_v0  ;;  %v377_v32 = vmul.f32 %v349_v1, %v349_v1 }
  0x4f   : > { %v351_v6 = vld [vmem:[%s266_s12 + $0x38] sm:$0xff]  ;;  %v360_v7 = vadd.f32 %v345_v4, %v344_v2  ;;  %v346_v8 = vld [vmem:[%s266_s12 + $0x10] sm:$0xff]  ;;  %v352_v14 = vld [vmem:[%s275_s6] sm:$0xff]  ;;  %v372_v25 = vmul.f32 %v344_v2, %v344_v2  ;;  %v373_v26 = vmul.f32 %v345_v4, %v345_v4  ;;  %v378_v29 = vmul.f32 %v350_v5, %v350_v5  ;;  %s1357_s21 = smov (!%p324_p9, %s1056_s21), 1 }
  0x50   : > { %v347_v9 = vld [vmem:[%s266_s12 + $0x18] sm:$0xff]  ;;  %367 = vadd.xlane.f32.xlu1 %v366_v3  ;;  %v369_v10 = vadd.f32 %v351_v6, %v350_v5  ;;  %v354_v12 = vld [vmem:[%s275_s6 + $0x10] sm:$0xff]  ;;  %v353_v15 = vld [vmem:[%s275_s6 + $0x8] sm:$0xff]  ;;  %v374_v23 = vmul.f32 %v346_v8, %v346_v8  ;;  %v379_v30 = vmul.f32 %v351_v6, %v351_v6  ;;  %v386_v37 = vadd.f32 %v377_v32, %v376_v31  ;;  %s1265_s29 = sshll.u32 %s1357_s21, 5 }
  0x51   : > { %361 = vadd.xlane.f32.xlu0 %v360_v7  ;;  %v363_v11 = vadd.f32 %v347_v9, %v346_v8  ;;  %v355_v13 = vld [vmem:[%s275_s6 + $0x18] sm:$0xff]  ;;  %v392_v17 = vadd.f32 %v353_v15, %v352_v14  ;;  %v358_v18 = vld [vmem:[%s275_s6 + $0x30] sm:$0xff]  ;;  %v356_v20 = vld [vmem:[%s275_s6 + $0x20] sm:$0xff]  ;;  %v375_v24 = vmul.f32 %v347_v9, %v347_v9  ;;  %v380_v33 = vadd.f32 %v373_v26, %v372_v25  ;;  %s328_s18 = scalar_lea.vmem %s1339_s2, %s1265_s29  ;;  %s338_s9 = scalar_lea.vmem %s1341_s4, %s1265_s29 }
  0x52   : > { %v395_v16 = vadd.f32 %v355_v13, %v354_v12  ;;  %v359_v19 = vld [vmem:[%s275_s6 + $0x38] sm:$0xff]  ;;  %v357_v21 = vld [vmem:[%s275_s6 + $0x28] sm:$0xff]  ;;  %v389_v34 = vadd.f32 %v379_v30, %v378_v29  ;;  %v406_v35 = vmul.f32 %v354_v12, %v354_v12  ;;  %v407_v36 = vmul.f32 %v355_v13, %v355_v13  ;;  %s1301_s8 = scalar_lea.vmem %s1340_s3, %s1265_s29  ;;  %s343_s15 = scalar_lea.vmem %s1342_s5, %s1265_s29 }
  0x53   : > { %v401_v22 = vadd.f32 %v359_v19, %v358_v18  ;;  %v398_v27 = vadd.f32 %v357_v21, %v356_v20  ;;  %v383_v28 = vadd.f32 %v375_v24, %v374_v23  ;;  %v404_v38 = vmul.f32 %v352_v14, %v352_v14 }
  0x54   : > { %370 = vadd.xlane.f32.xlu1 %v369_v10  ;;  %v405_v39 = vmul.f32 %v353_v15, %v353_v15  ;;  %v415_v40 = vadd.f32 %v407_v36, %v406_v35  ;;  %v410_v41 = vmul.f32 %v358_v18, %v358_v18  ;;  %v411_v42 = vmul.f32 %v359_v19, %v359_v19 }
  0x55   : > { %364 = vadd.xlane.f32.xlu0 %v363_v11  ;;  %v408_v44 = vmul.f32 %v356_v20, %v356_v20  ;;  %v409_v45 = vmul.f32 %v357_v21, %v357_v21 }
  0x56   : > { %v412_v43 = vadd.f32 %v405_v39, %v404_v38  ;;  %v421_v46 = vadd.f32 %v411_v42, %v410_v41 }
  0x57   : > { %v418_v47 = vadd.f32 %v409_v45, %v408_v44 }
  0x58   : > { %396 = vadd.xlane.f32.xlu1 %v395_v16 }
  0x59   : > { %393 = vadd.xlane.f32.xlu0 %v392_v17 }
  0x5c   : > { %402 = vadd.xlane.f32.xlu1 %v401_v22 }
  0x5d   : > { %399 = vadd.xlane.f32.xlu0 %v398_v27 }
  0x60   : > { %384 = vadd.xlane.f32.xlu1 %v383_v28 }
  0x61   : > { %381 = vadd.xlane.f32.xlu0 %v380_v33 }
  0x64   : > { %390 = vadd.xlane.f32.xlu1 %v389_v34 }
  0x65   : > { %387 = vadd.xlane.f32.xlu0 %v386_v37 }
  0x68   : > { %416 = vadd.xlane.f32.xlu1 %v415_v40 }
  0x69   : > { %413 = vadd.xlane.f32.xlu0 %v412_v43 }
  0x6c   : > { %422 = vadd.xlane.f32.xlu1 %v421_v46 }
  0x6d   : > { %419 = vadd.xlane.f32.xlu0 %v418_v47 }
  0xdd   : > { %v368_v48 = vpop.xlane.xlu1 %367 }
  0xde   : > { %431 = vst.msk [vmem:[#allocation2 + $0x10] sm:$0xff] %vm428_vm0, %v368_v48  ;;  %v362_v49 = vpop.xlane.xlu0 %361 }
  0xdf   : > { %429 = vst.msk [vmem:[#allocation2] sm:$0xff] %vm428_vm0, %v362_v49 }
  0xe1   : > { %v371_v50 = vpop.xlane.xlu1 %370 }
  0xe2   : > { %432 = vst.msk [vmem:[#allocation2 + $0x18] sm:$0xff] %vm428_vm0, %v371_v50  ;;  %v365_v51 = vpop.xlane.xlu0 %364 }
  0xe3   : > { %430 = vst.msk [vmem:[#allocation2 + $0x8] sm:$0xff] %vm428_vm0, %v365_v51 }
  0xe5   : > { %v503_v52 = vld [vmem:[#allocation2 + $0x10] sm:$0xff]  ;;  %v397_v53 = vpop.xlane.xlu1 %396 }
  0xe6   : > { %v508_v54 = vmul.f32 0.00390625, %v503_v52  ;;  %v501_v55 = vld [vmem:[#allocation2] sm:$0xff]  ;;  %438 = vst.msk [vmem:[#allocation4 + $0x8] sm:$0xff] %vm428_vm0, %v397_v53  ;;  %v394_v56 = vpop.xlane.xlu0 %393 }
  0xe7   : > { %v506_v57 = vmul.f32 0.00390625, %v501_v55  ;;  %437 = vst.msk [vmem:[#allocation4] sm:$0xff] %vm428_vm0, %v394_v56 }
  0xe8   : > { %562 = vst.msk [vmem:[%s328_s18 + $0x10] sm:$0xff] %vm428_vm0, %v508_v54  ;;  %v524_v16 = vmul.f32 256.0, %v508_v54 }
  0xe9   : > { %560 = vst.msk [vmem:[%s328_s18] sm:$0xff] %vm428_vm0, %v506_v57  ;;  %v504_v58 = vld [vmem:[#allocation2 + $0x18] sm:$0xff]  ;;  %v403_v59 = vpop.xlane.xlu1 %402  ;;  %v522_v7 = vmul.f32 256.0, %v506_v57 }
  0xea   : > { %v509_v60 = vmul.f32 0.00390625, %v504_v58  ;;  %v502_v61 = vld [vmem:[#allocation2 + $0x8] sm:$0xff]  ;;  %440 = vst.msk [vmem:[#allocation4 + $0x18] sm:$0xff] %vm428_vm0, %v403_v59  ;;  %v400_v62 = vpop.xlane.xlu0 %399  ;;  %v528_v30 = vmul.f32 %v524_v16, %v508_v54 }
  0xeb   : > { %v507_v63 = vmul.f32 0.00390625, %v502_v61  ;;  %439 = vst.msk [vmem:[#allocation4 + $0x10] sm:$0xff] %vm428_vm0, %v400_v62  ;;  %v526_v18 = vmul.f32 %v522_v7, %v506_v57 }
  0xec   : > { %563 = vst.msk [vmem:[%s328_s18 + $0x18] sm:$0xff] %vm428_vm0, %v509_v60  ;;  %v525_v14 = vmul.f32 256.0, %v509_v60 }
  0xed   : > { %561 = vst.msk [vmem:[%s328_s18 + $0x8] sm:$0xff] %vm428_vm0, %v507_v63  ;;  %v511_v0 = vld [vmem:[#allocation4 + $0x8] sm:$0xff]  ;;  %v385_v1 = vpop.xlane.xlu1 %384  ;;  %v523_v6 = vmul.f32 256.0, %v507_v63 }
  0xee   : > { %v515_v2 = vmul.f32 0.00390625, %v511_v0  ;;  %v510_v3 = vld [vmem:[#allocation4] sm:$0xff]  ;;  %434 = vst.msk [vmem:[#allocation3 + $0x8] sm:$0xff] %vm428_vm0, %v385_v1  ;;  %v382_v4 = vpop.xlane.xlu0 %381  ;;  %v529_v26 = vmul.f32 %v525_v14, %v509_v60 }
  0xef   : > { %v514_v5 = vmul.f32 0.00390625, %v510_v3  ;;  %433 = vst.msk [vmem:[#allocation3] sm:$0xff] %vm428_vm0, %v382_v4  ;;  %v527_v15 = vmul.f32 %v523_v6, %v507_v63 }
  0xf0   : > { %601 = vst.msk [vmem:[%s338_s9 + $0x8] sm:$0xff] %vm428_vm0, %v515_v2  ;;  %v544_v24 = vmul.f32 256.0, %v515_v2 }
  0xf1   : > { %600 = vst.msk [vmem:[%s338_s9] sm:$0xff] %vm428_vm0, %v514_v5  ;;  %v513_v8 = vld [vmem:[#allocation4 + $0x18] sm:$0xff]  ;;  %v391_v9 = vpop.xlane.xlu1 %390  ;;  %v543_v27 = vmul.f32 256.0, %v514_v5 }
  0xf2   : > { %v517_v10 = vmul.f32 0.00390625, %v513_v8  ;;  %v512_v11 = vld [vmem:[#allocation4 + $0x10] sm:$0xff]  ;;  %436 = vst.msk [vmem:[#allocation3 + $0x18] sm:$0xff] %vm428_vm0, %v391_v9  ;;  %v388_v12 = vpop.xlane.xlu0 %387  ;;  %v548_v38 = vmul.f32 %v544_v24, %v515_v2 }
  0xf3   : > { %v516_v13 = vmul.f32 0.00390625, %v512_v11  ;;  %435 = vst.msk [vmem:[#allocation3 + $0x10] sm:$0xff] %vm428_vm0, %v388_v12  ;;  %v547_v41 = vmul.f32 %v543_v27, %v514_v5 }
  0xf4   : > { %603 = vst.msk [vmem:[%s338_s9 + $0x18] sm:$0xff] %vm428_vm0, %v517_v10  ;;  %v546_v39 = vmul.f32 256.0, %v517_v10 }
  0xf5   : > { %602 = vst.msk [vmem:[%s338_s9 + $0x10] sm:$0xff] %vm428_vm0, %v516_v13  ;;  %v519_v17 = vld [vmem:[#allocation3 + $0x8] sm:$0xff]  ;;  %v417_v19 = vpop.xlane.xlu1 %416  ;;  %v545_v42 = vmul.f32 256.0, %v516_v13 }
  0xf6   : > { %v531_v20 = vsub.f32 %v519_v17, %v527_v15  ;;  %v518_v21 = vld [vmem:[#allocation3] sm:$0xff]  ;;  %442 = vst.msk [vmem:[#allocation5 + $0x8] sm:$0xff] %vm428_vm0, %v417_v19  ;;  %v414_v22 = vpop.xlane.xlu0 %413  ;;  %v550_v53 = vmul.f32 %v546_v39, %v517_v10 }
  0xf7   : > { %v530_v23 = vsub.f32 %v518_v21, %v526_v18  ;;  %441 = vst.msk [vmem:[#allocation5] sm:$0xff] %vm428_vm0, %v414_v22  ;;  %v549_v54 = vmul.f32 %v545_v42, %v516_v13 }
  0xf8   : > { %v536_v25 = vmul.f32 0.003921569, %v531_v20 }
  0xf9   : > { %v535_v28 = vmul.f32 0.003921569, %v530_v23  ;;  %v521_v29 = vld [vmem:[#allocation3 + $0x18] sm:$0xff]  ;;  %v423_v31 = vpop.xlane.xlu1 %422 }
  0xfa   : > { %v565_v32 = vadd.f32 1e-05, %v536_v25  ;;  %v533_v33 = vsub.f32 %v521_v29, %v529_v26  ;;  %v520_v34 = vld [vmem:[#allocation3 + $0x10] sm:$0xff]  ;;  %444 = vst.msk [vmem:[#allocation5 + $0x18] sm:$0xff] %vm428_vm0, %v423_v31  ;;  %v420_v35 = vpop.xlane.xlu0 %419 }
  0xfb   : > { %v564_v36 = vadd.f32 1e-05, %v535_v28  ;;  %v532_v37 = vsub.f32 %v520_v34, %v528_v30  ;;  %443 = vst.msk [vmem:[#allocation5 + $0x10] sm:$0xff] %vm428_vm0, %v420_v35 }
  0xfc   : > { %934 = vrsqrt.f32 %v565_v32  ;;  %v538_v43 = vmul.f32 0.003921569, %v533_v33  ;;  %vm577_vm1 = vcmp.eq.f32.partialorder %v565_v32, inf  ;;  %vm579_vm2 = vcmp.eq.f32.partialorder %v565_v32, 0.0 }
  0xfd   : > { %936 = vrsqrt.f32 %v564_v36  ;;  %v540_v40 = vld [vmem:[#allocation5 + $0x8] sm:$0xff]  ;;  %v537_v44 = vmul.f32 0.003921569, %v532_v37  ;;  %v580_v63 = vand.u32 2147483648, %v565_v32  ;;  %vm570_vm3 = vcmp.eq.f32.partialorder %v564_v36, inf }
  0xfe   : > { %v552_v45 = vsub.f32 %v540_v40, %v548_v38  ;;  %v539_v46 = vld [vmem:[#allocation5] sm:$0xff]  ;;  %v567_v48 = vadd.f32 1e-05, %v538_v43  ;;  %vm572_vm4 = vcmp.eq.f32.partialorder %v564_v36, 0.0  ;;  %v573_v4 = vand.u32 2147483648, %v564_v36 }
  0xff   : > { %v551_v47 = vsub.f32 %v539_v46, %v547_v41  ;;  %v566_v49 = vadd.f32 1e-05, %v537_v44 }
 0x100   : > { %v556_v50 = vmul.f32 0.003921569, %v552_v45  ;;  %938 = vrsqrt.f32 %v567_v48  ;;  %vm591_vm5 = vcmp.eq.f32.partialorder %v567_v48, inf  ;;  %v594_v13 = vand.u32 2147483648, %v567_v48 }
 0x101   : > { %v555_v51 = vmul.f32 0.003921569, %v551_v47  ;;  %v542_v52 = vld [vmem:[#allocation5 + $0x18] sm:$0xff]  ;;  %940 = vrsqrt.f32 %v566_v49  ;;  %vm593_vm6 = vcmp.eq.f32.partialorder %v567_v48, 0.0  ;;  %vm584_vm7 = vcmp.eq.f32.partialorder %v566_v49, inf }
 0x102   : > { %v541_v55 = vld [vmem:[#allocation5 + $0x10] sm:$0xff]  ;;  %v605_v56 = vadd.f32 1e-05, %v556_v50  ;;  %v554_v58 = vsub.f32 %v542_v52, %v550_v53  ;;  %v587_v16 = vand.u32 2147483648, %v566_v49  ;;  %vm586_vm8 = vcmp.eq.f32.partialorder %v566_v49, 0.0 }
 0x103   : > { %v604_v57 = vadd.f32 1e-05, %v555_v51  ;;  %v553_v59 = vsub.f32 %v541_v55, %v549_v54 }
 0x104   : > { %942 = vrsqrt.f32 %v605_v56  ;;  %v558_v1 = vmul.f32 0.003921569, %v554_v58  ;;  %vm617_vm9 = vcmp.eq.f32.partialorder %v605_v56, inf  ;;  %v620_v23 = vand.u32 2147483648, %v605_v56 }
 0x105   : > { %944 = vrsqrt.f32 %v604_v57  ;;  %v557_v2 = vmul.f32 0.003921569, %v553_v59  ;;  %vm619_vm10 = vcmp.eq.f32.partialorder %v605_v56, 0.0  ;;  %vm610_vm11 = vcmp.eq.f32.partialorder %v604_v57, inf }
 0x106   : > { %v935_v60 = vpop.eup %934  ;;  %v607_v7 = vadd.f32 1e-05, %v558_v1  ;;  %v613_v26 = vand.u32 2147483648, %v604_v57  ;;  %vm612_vm12 = vcmp.eq.f32.partialorder %v604_v57, 0.0 }
 0x107   : > { %v937_v61 = vpop.eup %936  ;;  %v576_v62 = vmul.f32 %v935_v60, %v565_v32  ;;  %v606_v8 = vadd.f32 1e-05, %v557_v2 }
 0x108   : > { %v569_v0 = vmul.f32 %v937_v61, %v564_v36  ;;  %946 = vrsqrt.f32 %v607_v7  ;;  %vm631_vm13 = vcmp.eq.f32.partialorder %v607_v7, inf  ;;  %v634_v33 = vand.u32 2147483648, %v607_v7 }
 0x109   : > { %v578_v3 = vsel %vm577_vm1, %v565_v32, %v576_v62  ;;  %948 = vrsqrt.f32 %v606_v8  ;;  %vm633_vm14 = vcmp.eq.f32.partialorder %v607_v7, 0.0  ;;  %vm624_vm15 = vcmp.eq.f32.partialorder %v606_v8, inf }
 0x10a   : > { %v581_v5 = vsel %vm579_vm2, %v580_v63, %v578_v3  ;;  %v571_v6 = vsel %vm570_vm3, %v564_v36, %v569_v0  ;;  %v939_v10 = vpop.eup %938  ;;  %v627_v36 = vand.u32 2147483648, %v606_v8  ;;  %vm626_vm1 = vcmp.eq.f32.partialorder %v606_v8, 0.0 }
 0x10b   : > { %597 = vst.msk [vmem:[%s1301_s8 + $0x8] sm:$0xff] %vm428_vm0, %v581_v5  ;;  %v574_v9 = vsel %vm572_vm4, %v573_v4, %v571_v6  ;;  %v941_v11 = vpop.eup %940  ;;  %v590_v12 = vmul.f32 %v939_v10, %v567_v48 }
 0x10c   : > { %596 = vst.msk [vmem:[%s1301_s8] sm:$0xff] %vm428_vm0, %v574_v9  ;;  %v583_v14 = vmul.f32 %v941_v11, %v566_v49 }
 0x10d   : > { %v592_v15 = vsel %vm591_vm5, %v567_v48, %v590_v12 }
 0x10e   : > { %v943_v17 = vpop.eup %942  ;;  %v595_v18 = vsel %vm593_vm6, %v594_v13, %v592_v15  ;;  %v585_v19 = vsel %vm584_vm7, %v566_v49, %v583_v14 }
 0x10f   : > { %v945_v20 = vpop.eup %944  ;;  %599 = vst.msk [vmem:[%s1301_s8 + $0x18] sm:$0xff] %vm428_vm0, %v595_v18  ;;  %v588_v21 = vsel %vm586_vm8, %v587_v16, %v585_v19  ;;  %v616_v22 = vmul.f32 %v943_v17, %v605_v56 }
 0x110   : > { %598 = vst.msk [vmem:[%s1301_s8 + $0x10] sm:$0xff] %vm428_vm0, %v588_v21  ;;  %v609_v24 = vmul.f32 %v945_v20, %v604_v57 }
 0x111   : > { %v618_v25 = vsel %vm617_vm9, %v605_v56, %v616_v22 }
 0x112   : > { %v621_v27 = vsel %vm619_vm10, %v620_v23, %v618_v25  ;;  %v611_v28 = vsel %vm610_vm11, %v604_v57, %v609_v24  ;;  %v947_v30 = vpop.eup %946 }
 0x113   : > { %637 = vst.msk [vmem:[%s343_s15 + $0x8] sm:$0xff] %vm428_vm0, %v621_v27  ;;  %v614_v29 = vsel %vm612_vm12, %v613_v26, %v611_v28  ;;  %v949_v31 = vpop.eup %948  ;;  %v630_v32 = vmul.f32 %v947_v30, %v607_v7 }
 0x114   : > { %636 = vst.msk [vmem:[%s343_s15] sm:$0xff] %vm428_vm0, %v614_v29  ;;  %v623_v34 = vmul.f32 %v949_v31, %v606_v8 }
 0x115   : > { %v632_v35 = vsel %vm631_vm13, %v607_v7, %v630_v32 }
 0x116   : > { %v635_v37 = vsel %vm633_vm14, %v634_v33, %v632_v35  ;;  %v625_v38 = vsel %vm624_vm15, %v606_v8, %v623_v34 }
 0x117   : > { %639 = vst.msk [vmem:[%s343_s15 + $0x18] sm:$0xff] %vm428_vm0, %v635_v37  ;;  %v628_v39 = vsel %vm626_vm1, %v627_v36, %v625_v38 }
 0x118   : > { %638 = vst.msk [vmem:[%s343_s15 + $0x10] sm:$0xff] %vm428_vm0, %v628_v39 }
 0x119 PF: > { %s22_s23 = sadd.s32 1, %s1064_s23   ;;  %s1349_s18 = smov %s1048_s19 }
 0x11a   : > { %p19_p11 = scmp.ge.s32.totalorder %s22_s23, 4   ;;  %s1350_s19 = smov %s1052_s20 }
 0x11b   : > { %s1351_s20 = smov %s1149_s30  ;;  %s1352_s21 = smov %s1060_s22 }
 0x11c   : > { %s1353_s22 = smov %s1355_s25  ;;  %21 = sbr.rel (!%p19_p11) target bundleno = 6 (0x6), region = 129 }
 0x123   :  { %709 = vsyncpa [#allocation7], 1 }
 0x124   :  { %711 = vsyncpa [#allocation7 + $0x1], 1 }
 0x125   :  { %712 = vsyncpa [#allocation9], 1 }
 0x126   :  { %714 = vsyncpa [#allocation9 + $0x1], 1 }

</bundles_post_ra>
